<compile_context>
chip_gen: v7x
topology: tpu7x:2x2x1
jax: 0.10.0
libtpu: 0.0.40
codegen_flags: <defaults>
</compile_context>

<pallas_src>
import jax
import jax.numpy as jnp
from jax.experimental import pallas as pl
from jax.experimental.pallas import tpu as pltpu


def _alpha_vec_mul_kernel(alpha_ref, x_ref, o_ref):
    # alpha_ref: (1, D) f32, same block every grid step (resident in VMEM).
    # x_ref / o_ref: (TILE_B, D) tile of the batch.
    s = jax.nn.sigmoid(alpha_ref[...])                  # (1, D)  -> EUP
    o_ref[...] = (x_ref[...] * s).astype(o_ref.dtype)   # row-broadcast multiply -> VPU


def alpha_vector_multiplication(alpha, x, *, tile_b=512):
    """x: (B, D); alpha: (1, D) or (D,) float32 parameter. Returns x * sigmoid(alpha)."""
    B, D = x.shape
    alpha2d = alpha.reshape(1, D).astype(jnp.float32)

    # Block rows: whole B for small inputs (block == full array dim is always
    # legal); otherwise a multiple-of-8 tile (satisfies the (8,128) sublane
    # rule) that B is padded up to.
    if B <= tile_b:
        tb, pad = B, 0
        x_p = x
    else:
        tb = max(8, (min(tile_b, B) // 8) * 8)
        pad = (-B) % tb
        x_p = jnp.pad(x, ((0, pad), (0, 0))) if pad else x
    Bp = B + pad

    out = pl.pallas_call(
        _alpha_vec_mul_kernel,
        out_shape=jax.ShapeDtypeStruct((Bp, D), x.dtype),
        grid_spec=pltpu.PrefetchScalarGridSpec(
            num_scalar_prefetch=0,
            grid=(Bp // tb,),
            in_specs=[
                pl.BlockSpec((1, D), lambda i: (0, 0)),   # alpha: constant block
                pl.BlockSpec((tb, D), lambda i: (i, 0)),  # x tile over batch
            ],
            out_specs=pl.BlockSpec((tb, D), lambda i: (i, 0)),
        ),
        compiler_params=pltpu.CompilerParams(
            dimension_semantics=("parallel",),
        ),
    )(alpha2d, x_p)

    return out[:B] if pad else out


if __name__ == "__main__":
    key = jax.random.PRNGKey(0)
    k1, k2, k3 = jax.random.split(key, 3)

    # Case 1: small shapes consistent with the module (single block, tb == B).
    B1, D1 = 2, 32
    x1 = jax.random.normal(k1, (B1, D1), dtype=jnp.float32)
    alpha1 = jnp.zeros((1, D1), dtype=jnp.float32)  # matches nn.Parameter(np.zeros)
    o1 = alpha_vector_multiplication(alpha1, x1)

    # Case 2: larger lane-dense shapes exercising the batch grid + padding path.
    B2, D2 = 1040, 256
    x2 = jax.random.normal(k2, (B2, D2), dtype=jnp.float32)
    alpha2 = 0.5 * jax.random.normal(k3, (1, D2), dtype=jnp.float32)
    o2 = alpha_vector_multiplication(alpha2, x2, tile_b=512)

    jax.block_until_ready((o1, o2))

    # Reference check against the PyTorch forward semantics.
    ref1 = x1 * jax.nn.sigmoid(alpha1)
    ref2 = x2 * jax.nn.sigmoid(alpha2)
    assert jnp.allclose(o1, ref1, atol=1e-5), "case-1 output mismatch"
    assert jnp.allclose(o2, ref2, atol=1e-5), "case-2 output mismatch"
    assert o2.shape == (B2, D2), "case-2 shape mismatch"

    print("KERNEL_OK")
</pallas_src>

<mosaic_0001>
module attributes {stable_mosaic.version = 11 : i64} {
  func.func @_alpha_vec_mul_kernel(%arg0: i32, %arg1: memref<1x32xf32, #tpu.memory_space<vmem>>, %arg2: memref<2x32xf32, #tpu.memory_space<vmem>>, %arg3: memref<2x32xf32, #tpu.memory_space<vmem>>) attributes {dimension_semantics = [#tpu.dimension_semantics<parallel>], iteration_bounds = array<i64: 1>, scalar_prefetch = 0 : i64, scratch_operands = 0 : i64, tpu.core_type = #tpu.core_type<tc>, window_params = [{pipeline_mode = #tpu.pipeline_mode<synchronous>, transform_indices = @transform_0, window_bounds = array<i64: 1, 32>}, {transform_indices = @transform_1, window_bounds = array<i64: 2, 32>}, {transform_indices = @transform_2, window_bounds = array<i64: 2, 32>}]} {
    %c0 = arith.constant 0 : index
    %c0_0 = arith.constant 0 : index
    %0 = vector.load %arg1[%c0, %c0_0] : memref<1x32xf32, #tpu.memory_space<vmem>>, vector<1x32xf32>
    %1 = arith.negf %0 : vector<1x32xf32>
    %2 = math.exp %1 : vector<1x32xf32>
    %cst = arith.constant 1.000000e+00 : f32
    %3 = vector.broadcast %cst : f32 to vector<1x32xf32>
    %4 = arith.addf %3, %2 : vector<1x32xf32>
    %5 = arith.divf %3, %4 : vector<1x32xf32>
    %c0_1 = arith.constant 0 : index
    %c0_2 = arith.constant 0 : index
    %6 = vector.load %arg2[%c0_1, %c0_2] : memref<2x32xf32, #tpu.memory_space<vmem>>, vector<2x32xf32>
    %7 = vector.broadcast %5 : vector<1x32xf32> to vector<2x32xf32>
    %8 = arith.mulf %6, %7 : vector<2x32xf32>
    %c0_3 = arith.constant 0 : index
    %c0_4 = arith.constant 0 : index
    %9 = vector.load %arg3[%c0_3, %c0_4] : memref<2x32xf32, #tpu.memory_space<vmem>>, vector<2x32xf32>
    tpu.vector_store %arg3[%c0_3, %c0_4], %8 {strides = array<i32>} : memref<2x32xf32, #tpu.memory_space<vmem>>, vector<2x32xf32>,
    return
  }
  func.func @transform_0(%arg0: i32) -> (i32, i32) {
    %c0_i32 = arith.constant 0 : i32
    %c0_i32_0 = arith.constant 0 : i32
    %c0_i32_1 = arith.constant 0 : i32
    return %c0_i32, %c0_i32_0 : i32, i32
  }
  func.func @transform_1(%arg0: i32) -> (i32, i32) {
    %c0_i32 = arith.constant 0 : i32
    %c0_i32_0 = arith.constant 0 : i32
    return %arg0, %c0_i32 : i32, i32
  }
  func.func @transform_2(%arg0: i32) -> (i32, i32) {
    %c0_i32 = arith.constant 0 : i32
    %c0_i32_0 = arith.constant 0 : i32
    return %arg0, %c0_i32 : i32, i32
  }
}

</mosaic_0001>

<bundles_post_ra>
// kernel: tpu_custom_call.1
= control target key start
LH: loop header
LB: loop body
LE: loop exit
PB: predicated region body
PF: predicated region fallthrough
CT: control target
= control target key end

     0   :  { %7 = vsyncpa [#allocation3], 0  ;;  %s155_s0 = inlined_call_operand.hbm [shape: f32[1,32], index: 0, kind: input, shape index: {}]   ;;  %s156_s1 = inlined_call_operand.vmem [shape: f32[2,32], index: 1, kind: input, shape index: {}]   ;;  %s157_s2 = inlined_call_operand.hbm [shape: f32[2,32], index: 2, kind: output, shape index: {}]  }
   0x1   :  { %8 = vsyncpa [#allocation4], 0  ;;  %s111_s9 = smov [#allocation2]   ;;  %s63_s13 = scalar_lea.hbm %s155_s0, 16 }
   0x2   :  { %s15_s10 = sshll.u32 %s111_s9, 4  ;;  %p64_p0 = scmp.ne.s32.totalorder %s155_s0, %s63_s13  ;;  %s16_s10 = int_to_ptr.vmem [resolvable:$true] %s15_s10 }
   0x3   :  { %p67_p1 = scmp.lt.u32.totalorder %s63_s13, %s155_s0 }
   0x5   :  { %p69_p2 = pnand %p67_p1, %p64_p0 }
   0x7   :  { %72 = shalt.err (!%p69_p2)
}
   0x8   :  { %s73_s18 = scalar_lea.vmem %s16_s10, 16  ;;  %s77_s19 = scalar_lea.vmem %s16_s10, 32 }
   0x9   :  { %p74_p3 = scmp.ne.s32.totalorder %s16_s10, %s73_s18  ;;  %p78_p4 = scmp.lt.s32.totalorder %s16_s10, %s16_s10 }
   0xa   :  { %p79_p5 = scmp.lt.s32.totalorder %s77_s19, %s73_s18 }
   0xc   :  { %p80_p6 = por %p79_p5, %p78_p4 }
   0xe   :  { %p81_p7 = pnand %p80_p6, %p74_p3 }
  0x10   :  { %84 = shalt.err (!%p81_p7)
}
  0x11   :  { %18 = dma.hbm_to_vmem [thread:$0]  %s155_s0, 16, %s16_s10, [#allocation3]  }
  0x12   :  { %107 = dma.done.wait [#allocation3], 16  }
  0x13   :  { %108 = vsyncadd [#allocation3], 4294967280  ;;  %v24_v0 = vld [vmem:[#allocation2] sm:$0x1]  ;;  %v33_v4 = vlaneseq  ;;  %v31_v8 = vld [vmem:[%s156_s1] sm:$0x3] }
  0x14   :  { %v56_v1 = vmul.f32 -1.442695, %v24_v0  ;;  %s112_s24 = smov [#allocation5]   ;;  %vm39_vm0 = vcmask 254976  }
  0x15   :  { %v34_v5 = vshrl.u32 %v33_v4, 7  ;;  %s47_s25 = sshll.u32 %s112_s24, 4  ;;  %s48_s25 = int_to_ptr.vmem [resolvable:$true] %s47_s25 }
  0x16   :  { %59 = vpow2.f32 %v56_v1  ;;  %s85_s0 = scalar_lea.vmem %s48_s25, 32  ;;  %p90_p9 = scmp.lt.s32.totalorder %s48_s25, %s48_s25 }
  0x17   :  { %v35_v6 = vsub.s32 0, %v34_v5  ;;  %p86_p8 = scmp.ne.s32.totalorder %s48_s25, %s85_s0  ;;  %p91_p10 = scmp.lt.s32.totalorder %s85_s0, %s85_s0 }
  0x19   :  { %p92_p11 = por %p91_p10, %p90_p9 }
  0x1b   :  { %p93_p12 = pnand %p92_p11, %p86_p8 }
  0x20   :  { %v60_v2 = vpop.eup %59 }
  0x21   :  { %v28_v3 = vadd.f32 1.0, %v60_v2 }
  0x23   :  { %61 = vrcp.f32 %v28_v3 }
  0x2d   :  { %v62_v7 = vpop.eup %61 }
  0x2e   :  { %v36_v9 = vrot.slane %v62_v7, %v35_v6 }
  0x30   :  { %v38_v10 = vmul.f32 %v36_v9, %v31_v8 }
  0x32   :  { %40 = vst.msk [vmem:[#allocation5] sm:$0x3] %vm39_vm0, %v38_v10 }
  0x33   :  { %96 = shalt.err (!%p93_p12)
}
  0x34   :  { %s97_s28 = scalar_lea.hbm %s157_s2, 32 }
  0x35   :  { %p98_p13 = scmp.ne.s32.totalorder %s157_s2, %s97_s28  ;;  %p101_p0 = scmp.lt.u32.totalorder %s97_s28, %s157_s2 }
  0x37   :  { %p103_p1 = pnand %p101_p0, %p98_p13 }
  0x39   :  { %106 = shalt.err (!%p103_p1)
}
  0x3a   :  { %50 = dma.vmem_to_hbm [thread:$0]  %s48_s25, 32, %s157_s2, [#allocation4]  }
  0x3b   :  { %109 = dma.done.wait [#allocation4], 32  }
  0x3c   :  { %110 = vsyncadd [#allocation4], 4294967264 }
  0x3d   :  { %54 = vsyncpa [#allocation3], 1 }
  0x3e   :  { %55 = vsyncpa [#allocation4], 1 }

</bundles_post_ra>
